<compile_context>
chip_gen: v5e
topology: v5e:2x2
jax: 0.10.0
libtpu: 0.0.40
codegen_flags: <defaults>
</compile_context>

<pallas_src>
import jax
import jax.numpy as jnp
from jax.experimental import pallas as pl
from jax.experimental.pallas import tpu as pltpu

# ----------------------------- config (scaled down) -------------------------
BATCH = 8
SEQ = 8
HIDDEN = 128          # scaled-down stand-in for config['hidden_size'] = 768
NUM_LABELS = 7        # config['num_labels']
NUM_DOMAINS = 2
VOCAB = 100
VOCAB_PAD = 128       # pad vocab to a full lane width for the one-hot matmul
HEAD_PAD = 128        # fused sentiment|domain head padded to 128 lanes

_NEG = -1e30          # plain Python literal (inlined; NOT a captured jnp const)


def domain_adaptation_kernel(ids_ref, mask_ref,
                             ew_ref, bp_ref,
                             wh_ref, bh_ref,
                             out_ref):
    ids = ids_ref[...]                       # [B, S] int32
    mask = mask_ref[...]                     # [B, S] int32

    # ---- fused embedding gather + masked mean pool (encoder stand-in) ------
    # Attention mask folded into the one-hot compare (no separate f32 mul):
    # counts[b, v] = sum_s (ids[b,s] == v) & (mask[b,s] > 0)   -> [B, VOCAB_PAD]
    vocab_iota = jax.lax.broadcasted_iota(jnp.int32, (BATCH, SEQ, VOCAB_PAD), 2)
    one_hot = ((ids[:, :, None] == vocab_iota)
               & (mask[:, :, None] > 0)).astype(jnp.float32)
    counts = jnp.sum(one_hot, axis=1)                            # [B, V] f32 (exact ints)

    denom = jnp.maximum(jnp.sum(mask.astype(jnp.float32), axis=1,
                                keepdims=True), 1.0)             # [B, 1]
    inv_denom = 1.0 / denom                                      # exact; tiny [8,1]

    # counts @ (E @ Wp): pooler weight pre-folded into the embedding table.
    # (Exact: the per-row inv_denom scale commutes with the second matmul.)
    pre = jnp.dot(counts.astype(jnp.bfloat16), ew_ref[...],
                  preferred_element_type=jnp.float32)            # [B, H] f32

    # ---- BERT pooler stand-in: tanh(mean_pool @ Wp + bp) --------------------
    pooled = jnp.tanh(pre * inv_denom + bp_ref[...])             # [B, H] f32

    # dropout (eval) and GradientReversalFn.forward are identities.
    # ---- fused lane-dense heads: [sent(7) | dom(2) | zero-pad] --------------
    logits = (jnp.dot(pooled.astype(jnp.bfloat16), wh_ref[...],
                      preferred_element_type=jnp.float32)
              + bh_ref[...])                                     # [B, 128] f32

    lane = jax.lax.broadcasted_iota(jnp.int32, logits.shape, 1)
    sent_mask = lane < NUM_LABELS
    dom_mask = (lane >= NUM_LABELS) & (lane < NUM_LABELS + NUM_DOMAINS)
    valid = sent_mask | dom_mask

    # ---- merged dual log-softmax: one shift, one exp, shared denominators ---
    m_sent = jnp.max(jnp.where(sent_mask, logits, _NEG), axis=-1, keepdims=True)
    m_dom = jnp.max(jnp.where(dom_mask, logits, _NEG), axis=-1, keepdims=True)
    shift = jnp.where(sent_mask, m_sent, m_dom)                  # per-lane shift
    s = logits - shift
    e = jnp.where(valid, jnp.exp(s), 0.0)                        # single [8,128] exp
    den_sent = jnp.sum(jnp.where(sent_mask, e, 0.0), axis=-1, keepdims=True)
    den_dom = jnp.sum(e, axis=-1, keepdims=True) - den_sent
    log_den = jnp.where(sent_mask, jnp.log(den_sent), jnp.log(den_dom))

    # Single lane-dense (8, 128) store; wrapper slices the two heads out.
    out_ref[...] = jnp.where(valid, s - log_den, 0.0)


def domain_adaptation_forward(input_ids, attention_mask, params):
    ids = input_ids.astype(jnp.int32)
    mask = attention_mask.astype(jnp.int32)

    inputs = (ids, mask,
              params["emb_pooler_w"], params["pooler_b"],
              params["heads_w"], params["heads_b"])

    bytes_accessed = sum(int(x.size) * x.dtype.itemsize for x in inputs)
    bytes_accessed += BATCH * HEAD_PAD * 4                    # output block
    flops = 2 * BATCH * HIDDEN * (VOCAB_PAD + HEAD_PAD)       # two MXU matmuls
    transcendentals = BATCH * (HIDDEN + HEAD_PAD + 2)         # tanh + exp + log

    vmem = pl.BlockSpec(memory_space=pltpu.MemorySpace.VMEM)
    out = pl.pallas_call(
        domain_adaptation_kernel,
        out_shape=jax.ShapeDtypeStruct((BATCH, HEAD_PAD), jnp.float32),
        in_specs=[vmem] * len(inputs),
        out_specs=vmem,
        cost_estimate=pl.CostEstimate(flops=flops,
                                      transcendentals=transcendentals,
                                      bytes_accessed=bytes_accessed),
    )(*inputs)

    sent_pred = out[:, :NUM_LABELS]
    dom_pred = out[:, NUM_LABELS:NUM_LABELS + NUM_DOMAINS]
    return sent_pred, dom_pred


def init_params(key):
    ks = jax.random.split(key, 6)
    scale = 0.02
    emb = scale * jax.random.normal(ks[0], (VOCAB, HIDDEN), jnp.float32)
    emb_pad = jnp.zeros((VOCAB_PAD, HIDDEN), jnp.float32).at[:VOCAB].set(emb)

    pooler_w = scale * jax.random.normal(ks[1], (HIDDEN, HIDDEN), jnp.float32)
    pooler_b = jnp.zeros((1, HIDDEN), jnp.float32)

    # Fold the pooler matmul into the embedding table.  Product computed in
    # f32, THEN cast to bf16 (casting factors first would compound rounding).
    emb_pooler_w = (emb_pad @ pooler_w).astype(jnp.bfloat16)    # [VOCAB_PAD, H]

    sent_w = scale * jax.random.normal(ks[2], (HIDDEN, NUM_LABELS), jnp.float32)
    sent_b = 0.01 * jax.random.normal(ks[3], (1, NUM_LABELS), jnp.float32)
    dom_w = scale * jax.random.normal(ks[4], (HIDDEN, NUM_DOMAINS), jnp.float32)
    dom_b = 0.01 * jax.random.normal(ks[5], (1, NUM_DOMAINS), jnp.float32)

    # fuse + pad the two classifier heads to one lane-dense (128,128) weight
    heads_w = jnp.zeros((HIDDEN, HEAD_PAD), jnp.float32)
    heads_w = heads_w.at[:, :NUM_LABELS].set(sent_w)
    heads_w = heads_w.at[:, NUM_LABELS:NUM_LABELS + NUM_DOMAINS].set(dom_w)
    heads_b = jnp.zeros((1, HEAD_PAD), jnp.float32)
    heads_b = heads_b.at[:, :NUM_LABELS].set(sent_b)
    heads_b = heads_b.at[:, NUM_LABELS:NUM_LABELS + NUM_DOMAINS].set(dom_b)

    return {
        # bf16 MXU operands (f32 accumulation in-kernel); biases stay f32
        "emb_pooler_w": emb_pooler_w,
        "pooler_b": pooler_b,
        "heads_w": heads_w.astype(jnp.bfloat16),
        "heads_b": heads_b,
    }


if __name__ == "__main__":
    key = jax.random.PRNGKey(0)
    k_param, k_ids, k_mask = jax.random.split(key, 3)

    params = init_params(k_param)
    input_ids = jax.random.randint(k_ids, (BATCH, SEQ), 0, VOCAB, dtype=jnp.int32)
    # make some trailing positions padded
    lengths = jax.random.randint(k_mask, (BATCH,), 3, SEQ + 1)
    attention_mask = (jnp.arange(SEQ)[None, :] < lengths[:, None]).astype(jnp.int32)

    sent_pred, dom_pred = domain_adaptation_forward(input_ids, attention_mask, params)
    jax.block_until_ready((sent_pred, dom_pred))

    # sanity: log-softmax rows should exponentiate-sum to 1
    assert sent_pred.shape == (BATCH, NUM_LABELS)
    assert dom_pred.shape == (BATCH, NUM_DOMAINS)
    assert jnp.allclose(jnp.sum(jnp.exp(sent_pred), axis=1), 1.0, atol=1e-4)
    assert jnp.allclose(jnp.sum(jnp.exp(dom_pred), axis=1), 1.0, atol=1e-4)

    print("KERNEL_OK")
</pallas_src>

<mosaic_0001>
module attributes {stable_mosaic.version = 11 : i64} {
  func.func @domain_adaptation_kernel(%arg0: memref<8x8xi32, #tpu.memory_space<vmem>>, %arg1: memref<8x8xi32, #tpu.memory_space<vmem>>, %arg2: memref<128x128xbf16, #tpu.memory_space<vmem>>, %arg3: memref<1x128xf32, #tpu.memory_space<vmem>>, %arg4: memref<128x128xbf16, #tpu.memory_space<vmem>>, %arg5: memref<1x128xf32, #tpu.memory_space<vmem>>, %arg6: memref<8x128xf32, #tpu.memory_space<vmem>>) attributes {dimension_semantics = [], scalar_prefetch = 0 : i64, scratch_operands = 0 : i64, tpu.core_type = #tpu.core_type<tc>} {
    %c0 = arith.constant 0 : index
    %c0_0 = arith.constant 0 : index
    %0 = vector.load %arg0[%c0, %c0_0] : memref<8x8xi32, #tpu.memory_space<vmem>>, vector<8x8xi32>
    %c0_1 = arith.constant 0 : index
    %c0_2 = arith.constant 0 : index
    %1 = vector.load %arg1[%c0_1, %c0_2] : memref<8x8xi32, #tpu.memory_space<vmem>>, vector<8x8xi32>
    %2 = tpu.iota {dimensions = array<i32: 2>} : vector<8x8x128xi32>
    %3 = vector.shape_cast %0 : vector<8x8xi32> to vector<8x8x1xi32>
    %4 = vector.broadcast %3 : vector<8x8x1xi32> to vector<8x8x128xi32>
    %5 = arith.cmpi eq, %4, %2 : vector<8x8x128xi32>
    %6 = vector.shape_cast %1 : vector<8x8xi32> to vector<8x8x1xi32>
    %c0_i32 = arith.constant 0 : i32
    %7 = vector.broadcast %c0_i32 : i32 to vector<8x8x1xi32>
    %8 = arith.cmpi sgt, %6, %7 : vector<8x8x1xi32>
    %9 = vector.broadcast %8 : vector<8x8x1xi1> to vector<8x8x128xi1>
    %10 = arith.andi %5, %9 : vector<8x8x128xi1>
    %11 = arith.extui %10 : vector<8x8x128xi1> to vector<8x8x128xi32>
    %12 = arith.sitofp %11 : vector<8x8x128xi32> to vector<8x8x128xf32>
    %cst = arith.constant dense<0.000000e+00> : vector<8x128xf32>
    %13 = vector.multi_reduction <add>, %12, %cst [1] : vector<8x8x128xf32> to vector<8x128xf32>
    %14 = arith.sitofp %1 : vector<8x8xi32> to vector<8x8xf32>
    %cst_3 = arith.constant dense<0.000000e+00> : vector<8xf32>
    %15 = vector.multi_reduction <add>, %14, %cst_3 [1] : vector<8x8xf32> to vector<8xf32>
    %16 = vector.shape_cast %15 : vector<8xf32> to vector<8x1xf32>
    %cst_4 = arith.constant 1.000000e+00 : f32
    %17 = vector.broadcast %cst_4 : f32 to vector<8x1xf32>
    %18 = arith.maximumf %16, %17 : vector<8x1xf32>
    %cst_5 = arith.constant 1.000000e+00 : f32
    %19 = vector.broadcast %cst_5 : f32 to vector<8x1xf32>
    %20 = arith.divf %19, %18 : vector<8x1xf32>
    %21 = arith.truncf %13 : vector<8x128xf32> to vector<8x128xbf16>
    %c0_6 = arith.constant 0 : index
    %c0_7 = arith.constant 0 : index
    %22 = vector.load %arg2[%c0_6, %c0_7] : memref<128x128xbf16, #tpu.memory_space<vmem>>, vector<128x128xbf16>
    %cst_8 = arith.constant dense<0.000000e+00> : vector<8x128xf32>
    %23 = tpu.matmul %21, %22, %cst_8 {dimension_numbers = #tpu.dot_dimension_numbers<[1], [0], [0], [1], [0, 0, 1, 1], [], []>} : vector<8x128xbf16>, vector<128x128xbf16>, vector<8x128xf32> -> vector<8x128xf32>
    %24 = vector.broadcast %20 : vector<8x1xf32> to vector<8x128xf32>
    %25 = arith.mulf %23, %24 : vector<8x128xf32>
    %c0_9 = arith.constant 0 : index
    %c0_10 = arith.constant 0 : index
    %26 = vector.load %arg3[%c0_9, %c0_10] : memref<1x128xf32, #tpu.memory_space<vmem>>, vector<1x128xf32>
    %27 = vector.broadcast %26 : vector<1x128xf32> to vector<8x128xf32>
    %28 = arith.addf %25, %27 : vector<8x128xf32>
    %29 = math.tanh %28 : vector<8x128xf32>
    %30 = arith.truncf %29 : vector<8x128xf32> to vector<8x128xbf16>
    %c0_11 = arith.constant 0 : index
    %c0_12 = arith.constant 0 : index
    %31 = vector.load %arg4[%c0_11, %c0_12] : memref<128x128xbf16, #tpu.memory_space<vmem>>, vector<128x128xbf16>
    %cst_13 = arith.constant dense<0.000000e+00> : vector<8x128xf32>
    %32 = tpu.matmul %30, %31, %cst_13 {dimension_numbers = #tpu.dot_dimension_numbers<[1], [0], [0], [1], [0, 0, 1, 1], [], []>} : vector<8x128xbf16>, vector<128x128xbf16>, vector<8x128xf32> -> vector<8x128xf32>
    %c0_14 = arith.constant 0 : index
    %c0_15 = arith.constant 0 : index
    %33 = vector.load %arg5[%c0_14, %c0_15] : memref<1x128xf32, #tpu.memory_space<vmem>>, vector<1x128xf32>
    %34 = vector.broadcast %33 : vector<1x128xf32> to vector<8x128xf32>
    %35 = arith.addf %32, %34 : vector<8x128xf32>
    %36 = tpu.iota {dimensions = array<i32: 1>} : vector<8x128xi32>
    %c7_i32 = arith.constant 7 : i32
    %37 = vector.broadcast %c7_i32 : i32 to vector<8x128xi32>
    %38 = arith.cmpi slt, %36, %37 : vector<8x128xi32>
    %c7_i32_16 = arith.constant 7 : i32
    %39 = vector.broadcast %c7_i32_16 : i32 to vector<8x128xi32>
    %40 = arith.cmpi sge, %36, %39 : vector<8x128xi32>
    %c9_i32 = arith.constant 9 : i32
    %41 = vector.broadcast %c9_i32 : i32 to vector<8x128xi32>
    %42 = arith.cmpi slt, %36, %41 : vector<8x128xi32>
    %43 = arith.andi %40, %42 : vector<8x128xi1>
    %44 = arith.ori %38, %43 : vector<8x128xi1>
    %cst_17 = arith.constant -1.000000e+30 : f32
    %45 = vector.broadcast %cst_17 : f32 to vector<8x128xf32>
    %46 = arith.select %38, %35, %45 : vector<8x128xi1>, vector<8x128xf32>
    %cst_18 = arith.constant dense<0xFF800000> : vector<8xf32>
    %47 = vector.multi_reduction <maximumf>, %46, %cst_18 [1] : vector<8x128xf32> to vector<8xf32>
    %48 = vector.shape_cast %47 : vector<8xf32> to vector<8x1xf32>
    %cst_19 = arith.constant -1.000000e+30 : f32
    %49 = vector.broadcast %cst_19 : f32 to vector<8x128xf32>
    %50 = arith.select %43, %35, %49 : vector<8x128xi1>, vector<8x128xf32>
    %cst_20 = arith.constant dense<0xFF800000> : vector<8xf32>
    %51 = vector.multi_reduction <maximumf>, %50, %cst_20 [1] : vector<8x128xf32> to vector<8xf32>
    %52 = vector.shape_cast %51 : vector<8xf32> to vector<8x1xf32>
    %53 = vector.shape_cast %48 : vector<8x1xf32> to vector<8x1xf32>
    %54 = vector.broadcast %53 : vector<8x1xf32> to vector<8x128xf32>
    %55 = vector.shape_cast %52 : vector<8x1xf32> to vector<8x1xf32>
    %56 = vector.broadcast %55 : vector<8x1xf32> to vector<8x128xf32>
    %57 = arith.select %38, %54, %56 : vector<8x128xi1>, vector<8x128xf32>
    %58 = arith.subf %35, %57 : vector<8x128xf32>
    %59 = math.exp %58 : vector<8x128xf32>
    %cst_21 = arith.constant 0.000000e+00 : f32
    %60 = vector.broadcast %cst_21 : f32 to vector<8x128xf32>
    %61 = arith.select %44, %59, %60 : vector<8x128xi1>, vector<8x128xf32>
    %cst_22 = arith.constant 0.000000e+00 : f32
    %62 = vector.broadcast %cst_22 : f32 to vector<8x128xf32>
    %63 = arith.select %38, %61, %62 : vector<8x128xi1>, vector<8x128xf32>
    %cst_23 = arith.constant dense<0.000000e+00> : vector<8xf32>
    %64 = vector.multi_reduction <add>, %63, %cst_23 [1] : vector<8x128xf32> to vector<8xf32>
    %65 = vector.shape_cast %64 : vector<8xf32> to vector<8x1xf32>
    %cst_24 = arith.constant dense<0.000000e+00> : vector<8xf32>
    %66 = vector.multi_reduction <add>, %61, %cst_24 [1] : vector<8x128xf32> to vector<8xf32>
    %67 = vector.shape_cast %66 : vector<8xf32> to vector<8x1xf32>
    %68 = arith.subf %67, %65 : vector<8x1xf32>
    %69 = math.log %65 : vector<8x1xf32>
    %70 = math.log %68 : vector<8x1xf32>
    %71 = vector.shape_cast %69 : vector<8x1xf32> to vector<8x1xf32>
    %72 = vector.broadcast %71 : vector<8x1xf32> to vector<8x128xf32>
    %73 = vector.shape_cast %70 : vector<8x1xf32> to vector<8x1xf32>
    %74 = vector.broadcast %73 : vector<8x1xf32> to vector<8x128xf32>
    %75 = arith.select %38, %72, %74 : vector<8x128xi1>, vector<8x128xf32>
    %76 = arith.subf %58, %75 : vector<8x128xf32>
    %cst_25 = arith.constant 0.000000e+00 : f32
    %77 = vector.broadcast %cst_25 : f32 to vector<8x128xf32>
    %78 = arith.select %44, %76, %77 : vector<8x128xi1>, vector<8x128xf32>
    %c0_26 = arith.constant 0 : index
    %c0_27 = arith.constant 0 : index
    %79 = vector.load %arg6[%c0_26, %c0_27] : memref<8x128xf32, #tpu.memory_space<vmem>>, vector<8x128xf32>
    tpu.vector_store %arg6[%c0_26, %c0_27], %78 {strides = array<i32>} : memref<8x128xf32, #tpu.memory_space<vmem>>, vector<8x128xf32>,
    return
  }
}

</mosaic_0001>

<bundles_post_ra>
// kernel: tpu_custom_call.1
= control target key start
LH: loop header
LB: loop body
LE: loop exit
PB: predicated region body
PF: predicated region fallthrough
CT: control target
= control target key end

     0   :  { %11 = vsyncpa [#allocation3], 0  ;;  %s921_s0 = inlined_call_operand.hbm [shape: s32[8,8], index: 0, kind: input, shape index: {}]   ;;  %s922_s1 = inlined_call_operand.hbm [shape: s32[8,8], index: 1, kind: input, shape index: {}]   ;;  %s923_s2 = inlined_call_operand.hbm [shape: bf16[128,128], index: 2, kind: input, shape index: {}]   ;;  %s924_s3 = inlined_call_operand.vmem [shape: f32[1,128], index: 3, kind: input, shape index: {}]   ;;  %s925_s4 = inlined_call_operand.hbm [shape: bf16[128,128], index: 4, kind: input, shape index: {}]   ;;  %s926_s5 = inlined_call_operand.vmem [shape: f32[1,128], index: 5, kind: input, shape index: {}]   ;;  %s927_s6 = inlined_call_operand.hbm [shape: f32[8,128], index: 6, kind: output, shape index: {}]  }
   0x1   :  { %12 = vsyncpa [#allocation6], 0 }
   0x2   :  { %13 = vsyncpa [#allocation9], 0  ;;  %s31_s23 = sshll.u32 %s922_s1, 4  ;;  %s32_s23 = int_to_ptr.hbm [resolvable:$true] %s31_s23 }
   0x3   :  { %14 = vsyncpa [#allocation4], 0  ;;  %s818_s24 = smov [#allocation5]   ;;  %s20_s28 = sshll.u32 %s921_s0, 4  ;;  %s21_s28 = int_to_ptr.hbm [resolvable:$true] %s20_s28 }
   0x4   :  { %s33_s25 = sshll.u32 %s818_s24, 4  ;;  %s819_s29 = smov [#allocation2]   ;;  %s34_s25 = int_to_ptr.vmem [resolvable:$true] %s33_s25 }
   0x5   :  { %36 = dma.hbm_to_vmem [thread:$0]  %s32_s23, 128, %s34_s25, [#allocation6]  }
   0x6   :  { %s22_s30 = sshll.u32 %s819_s29, 4  ;;  %s41_s9 = sshll.u32 %s923_s2, 4  ;;  %s23_s30 = int_to_ptr.vmem [resolvable:$true] %s22_s30  ;;  %s42_s9 = int_to_ptr.hbm [resolvable:$true] %s41_s9 }
   0x7   :  { %25 = dma.hbm_to_vmem [thread:$0]  %s21_s28, 128, %s23_s30, [#allocation3]  }
   0x8   :  { %s820_s1 = smov [#allocation7]   ;;  %s56_s13 = sshll.u32 %s925_s4, 4  ;;  %s57_s13 = int_to_ptr.hbm [resolvable:$true] %s56_s13 }
   0x9   :  { %s43_s10 = sshll.u32 %s820_s1, 4  ;;  %s821_s14 = smov 64   ;;  %s44_s10 = int_to_ptr.vmem [resolvable:$true] %s43_s10 }
   0xa   :  { %s822_s0 = smov 4   ;;  %s823_s15 = smov [#allocation8]  }
   0xb   :  { %49 = dma.hbm_to_vmem [thread:$0]  %s42_s9, 1024, %s44_s10, [#allocation6], %s821_s14, %s821_s14, %s822_s0  }
   0xc   :  { %s58_s16 = sshll.u32 %s823_s15, 4  ;;  %s59_s16 = int_to_ptr.vmem [resolvable:$true] %s58_s16 }
   0xd   :  { %64 = dma.hbm_to_vmem [thread:$0]  %s57_s13, 1024, %s59_s16, [#allocation9], %s821_s14, %s821_s14, %s822_s0  }
   0xe   :  { %810 = dma.done.wait [#allocation3], 128  }
   0xf   :  { %811 = vsyncadd [#allocation3], 4294967168 }
  0x10   :  { %812 = dma.done.wait [#allocation6], 1152  }
  0x11   :  { %813 = vsyncadd [#allocation6], 4294966144 }
  0x12   :  { %814 = dma.done.wait [#allocation9], 1024  }
  0x13   :  { %815 = vsyncadd [#allocation9], 4294966272  ;;  %v85_v0 = vlaneseq  ;;  %v84_v2 = vld [vmem:[#allocation5] sm:$0xff]  ;;  %v83_v3 = vld [vmem:[#allocation2] sm:$0xff]  ;;  %vm304_vm0 = vcmask 64512   ;;  %v824_v35 = vmov 0.0  }
  0x14   :  { %v151_v4 = vperm.slane %v84_v2, 0  ;;  %v101_v5 = vperm.slane %v83_v3, 2  ;;  %v87_v6 = vperm.slane %v83_v3, 0  ;;  %v158_v7 = vperm.slane %v84_v2, 1  ;;  %v658_v21 = vld [vmem:[#allocation7 + $0x38] sm:$0xff]  ;;  %v657_v24 = vld [vmem:[#allocation7 + $0x30] sm:$0xff] }
  0x15   :  { %v89_v1 = vshrl.u32 %v85_v0, 7  ;;  %v165_v8 = vperm.slane %v84_v2, 2  ;;  %v94_v9 = vperm.slane %v83_v3, 1  ;;  %v172_v10 = vperm.slane %v84_v2, 3  ;;  %428 = vmatpush.bf16.msra.mxu0 %v658_v21  ;;  %v656_v26 = vld [vmem:[#allocation7 + $0x28] sm:$0xff]  ;;  %v655_v32 = vld [vmem:[#allocation7 + $0x20] sm:$0xff] }
  0x16   :  { %v115_v11 = vperm.slane %v83_v3, 4  ;;  %v108_v12 = vperm.slane %v83_v3, 3  ;;  %v122_v13 = vperm.slane %v83_v3, 5  ;;  %v186_v14 = vperm.slane %v84_v2, 5  ;;  %v654_v34 = vld [vmem:[#allocation7 + $0x18] sm:$0xff]  ;;  %v653_v41 = vld [vmem:[#allocation7 + $0x10] sm:$0xff] }
  0x17   :  { %677 = vset.pattern.permute.xlu2 %v89_v1  ;;  %676 = vset.pattern.permute.xlu1 %v89_v1  ;;  %v179_v15 = vperm.slane %v84_v2, 4  ;;  %v193_v16 = vperm.slane %v84_v2, 6  ;;  %v136_v17 = vperm.slane %v83_v3, 7  ;;  %v129_v18 = vperm.slane %v83_v3, 6  ;;  %v652_v45 = vld [vmem:[#allocation7 + $0x8] sm:$0xff]  ;;  %v651_v53 = vld [vmem:[#allocation7] sm:$0xff] }
  0x18   :  { %675 = vset.pattern.permute.xlu0 %v89_v1  ;;  %v200_v19 = vperm.slane %v84_v2, 7  ;;  %v303_v27 = vcvt.s32.f32 %v84_v2  ;;  %v873_v28 = vand.u32 127, %v85_v0  ;;  %s567_s21 = sshll.u32 %s927_s6, 4  ;;  %s568_s21 = int_to_ptr.hbm [resolvable:$true] %s567_s21 }
  0x19   :  { %429 = vmatpush.bf16.msra.mxu0 %v657_v24 }
  0x1a   :  { %v305_v31 = vsel %vm304_vm0, %v303_v27, 0.0 }
  0x1d   :  { %430 = vmatpush.bf16.msra.mxu0 %v656_v26 }
  0x1f   :  { %156 = vperm.xlu1 %676, %v151_v4   ;;  %106 = vperm.xlu2 %677, %v101_v5  }
  0x20   :  { %92 = vperm.xlu0 %675, %v87_v6  }
  0x21   :  { %431 = vmatpush.bf16.msra.mxu0 %v655_v32 }
  0x25   :  { %432 = vmatpush.bf16.msra.mxu0 %v654_v34 }
  0x27   :  { %163 = vperm.xlu1 %676, %v158_v7   ;;  %170 = vperm.xlu2 %677, %v165_v8  }
  0x28   :  { %99 = vperm.xlu0 %675, %v94_v9  }
  0x29   :  { %433 = vmatpush.bf16.msra.mxu0 %v653_v41 }
  0x2d   :  { %434 = vmatpush.bf16.msra.mxu0 %v652_v45 }
  0x2f   :  { %177 = vperm.xlu1 %676, %v172_v10   ;;  %120 = vperm.xlu2 %677, %v115_v11  }
  0x30   :  { %113 = vperm.xlu0 %675, %v108_v12  }
  0x31   :  { %435 = vmatpush.bf16.msra.mxu0 %v651_v53 }
  0x37   :  { %127 = vperm.xlu1 %676, %v122_v13   ;;  %191 = vperm.xlu2 %677, %v186_v14  }
  0x38   :  { %184 = vperm.xlu0 %675, %v179_v15  }
  0x3f   :  { %198 = vperm.xlu1 %676, %v193_v16   ;;  %141 = vperm.xlu2 %677, %v136_v17  }
  0x40   :  { %134 = vperm.xlu0 %675, %v129_v18  }
  0x48   :  { %205 = vperm.xlu0 %675, %v200_v19  }
  0x69   :  { %306 = vadd.xlane.f32.xlu1 %v305_v31 }
  0x79   :  { %v107_v20 = vpop.permute.xlu2 %106 }
  0x7a   :  { %vm145_vm6 = vcmp.eq.s32.totalorder %v107_v20, %v873_v28 }
  0x81   :  { %v171_v25 = vpop.permute.xlu2 %170 }
  0x82   :  { %vm209_vm7 = vcmp.gt.s32.totalorder %v171_v25, 0 }
  0x83   :  { %vm233_vm10 = vmand %vm145_vm6, %vm209_vm7 }
  0x84   :  { %v581_v43 = vsel %vm233_vm10, 1.0, %v824_v35  ;;  %vm366_vm10 = vcmask 1042434  }
  0x85   :  { %v267_v48 = vrot.slane %v581_v43, 4 }
  0x87   :  { %v268_v57 = vadd.f32 %v581_v43, %v267_v48 }
  0x89   :  { %v121_v33 = vpop.permute.xlu2 %120  ;;  %v269_v2 = vrot.slane %v268_v57, 2 }
  0x8a   :  { %vm147_vm15 = vcmp.eq.s32.totalorder %v121_v33, %v873_v28 }
  0x8b   :  { %v270_v10 = vadd.f32 %v269_v2, %v268_v57  ;;  %v665_v2 = vld [vmem:[#allocation8 + $0x30] sm:$0xff] }
  0x8d   :  { %v271_v20 = vrot.slane %v270_v10, 1 }
  0x91   :  { %v157_v22 = vpop.permute.xlu1 %156  ;;  %v192_v49 = vpop.permute.xlu2 %191 }
  0x92   :  { %v93_v23 = vpop.permute.xlu0 %92  ;;  %vm207_vm3 = vcmp.gt.s32.totalorder %v157_v22, 0  ;;  %vm212_vm13 = vcmp.gt.s32.totalorder %v192_v49, 0 }
  0x93   :  { %vm143_vm4 = vcmp.eq.s32.totalorder %v93_v23, %v873_v28 }
  0x94   :  { %vm231_vm8 = vmand %vm143_vm4, %vm207_vm3 }
  0x95   :  { %v579_v39 = vsel %vm231_vm8, 1.0, %v824_v35 }
  0x96   :  { %v255_v44 = vrot.slane %v579_v39, 4 }
  0x98   :  { %v256_v51 = vadd.f32 %v579_v39, %v255_v44 }
  0x99   :  { %v164_v29 = vpop.permute.xlu1 %163  ;;  %v142_v15 = vpop.permute.xlu2 %141 }
  0x9a   :  { %v100_v30 = vpop.permute.xlu0 %99  ;;  %vm208_vm1 = vcmp.gt.s32.totalorder %v164_v29, 0  ;;  %v257_v60 = vrot.slane %v256_v51, 2  ;;  %vm150_vm6 = vcmp.eq.s32.totalorder %v142_v15, %v873_v28 }
  0x9b   :  { %vm144_vm2 = vcmp.eq.s32.totalorder %v100_v30, %v873_v28  ;;  %v272_v30 = vadd.f32 %v271_v20, %v270_v10  ;;  %v659_v10 = vld [vmem:[#allocation8] sm:$0xff]  ;;  %v678_v20 = vld [vmem:[%s924_s3] ss:$0 sm:$0xff]  ;;  %s825_s3 = smov [#allocation10]  }
  0x9c   :  { %vm232_vm5 = vmand %vm144_vm2, %vm208_vm1  ;;  %v258_v4 = vadd.f32 %v257_v60, %v256_v51 }
  0x9d   :  { %v580_v36 = vsel %vm232_vm5, 1.0, %v824_v35  ;;  %v326_v41 = vpack.c.bf16 %v272_v30, %v272_v30 }
  0x9e   :  { %v261_v40 = vrot.slane %v580_v36, 4  ;;  %v259_v13 = vrot.slane %v258_v4, 1 }
  0xa0   :  { %v262_v46 = vadd.f32 %v580_v36, %v261_v40  ;;  %v260_v22 = vadd.f32 %v259_v13, %v258_v4  ;;  %v663_v4 = vld [vmem:[#allocation8 + $0x20] sm:$0xff] }
  0xa1   :  { %v178_v37 = vpop.permute.xlu1 %177 }
  0xa2   :  { %vm210_vm9 = vcmp.gt.s32.totalorder %v178_v37, 0  ;;  %v114_v38 = vpop.permute.xlu0 %113  ;;  %v263_v54 = vrot.slane %v262_v46, 2  ;;  %v324_v33 = vpack.c.bf16 %v260_v22, %v260_v22 }
  0xa3   :  { %vm146_vm11 = vcmp.eq.s32.totalorder %v114_v38, %v873_v28 }
  0xa4   :  { %vm234_vm12 = vmand %vm146_vm11, %vm210_vm9  ;;  %v264_v62 = vadd.f32 %v263_v54, %v262_v46  ;;  %vm364_vm9 = vcmask 1041409   ;;  %v356_v44 = vunpack.c.l.b16 %v324_v33  ;;  %vm368_vm11 = vcmask 1043459  }
  0xa5   :  { %v582_v42 = vsel %vm234_vm12, 1.0, %v824_v35  ;;  %vm370_vm12 = vcmask 1044484  }
  0xa6   :  { %v273_v47 = vrot.slane %v582_v42, 4  ;;  %v265_v7 = vrot.slane %v264_v62, 1 }
  0xa8   :  { %v274_v55 = vadd.f32 %v582_v42, %v273_v47  ;;  %v266_v16 = vadd.f32 %v265_v7, %v264_v62 }
  0xa9   :  { %v128_v50 = vpop.permute.xlu1 %127 }
  0xaa   :  { %vm148_vm14 = vcmp.eq.s32.totalorder %v128_v50, %v873_v28  ;;  %v185_v52 = vpop.permute.xlu0 %184  ;;  %v275_v63 = vrot.slane %v274_v55, 2  ;;  %v325_v25 = vpack.c.bf16 %v266_v16, %v266_v16  ;;  %v358_v50 = vunpack.c.l.b16 %v326_v41 }
  0xab   :  { %vm236_vm0 = vmand %vm148_vm14, %vm212_vm13  ;;  %vm211_vm1 = vcmp.gt.s32.totalorder %v185_v52, 0  ;;  %vm372_vm13 = vcmask 1045509   ;;  %vm374_vm14 = vcmask 1046534  }
  0xac   :  { %v584_v56 = vsel %vm236_vm0, 1.0, %v824_v35  ;;  %vm235_vm2 = vmand %vm147_vm15, %vm211_vm1  ;;  %v276_v8 = vadd.f32 %v275_v63, %v274_v55  ;;  %v357_v37 = vunpack.c.l.b16 %v325_v25  ;;  %vm376_vm15 = vcmask 1047559  }
  0xad   :  { %v285_v58 = vrot.slane %v584_v56, 4  ;;  %v583_v59 = vsel %vm235_vm2, 1.0, %v824_v35 }
  0xae   :  { %v279_v61 = vrot.slane %v583_v59, 4  ;;  %v277_v17 = vrot.slane %v276_v8, 1  ;;  %v365_v46 = vsel %vm364_vm9, %v357_v37, %v356_v44 }
  0xaf   :  { %v286_v0 = vadd.f32 %v584_v56, %v285_v58  ;;  %v367_v53 = vsel %vm366_vm10, %v358_v50, %v365_v46 }
  0xb0   :  { %v280_v1 = vadd.f32 %v583_v59, %v279_v61  ;;  %v278_v26 = vadd.f32 %v277_v17, %v276_v8  ;;  %v661_v8 = vld [vmem:[#allocation8 + $0x10] sm:$0xff] }
  0xb1   :  { %v199_v3 = vpop.permute.xlu1 %198  ;;  %v287_v9 = vrot.slane %v286_v0, 2 }
  0xb2   :  { %v281_v5 = vrot.slane %v280_v1, 2  ;;  %vm213_vm3 = vcmp.gt.s32.totalorder %v199_v3, 0  ;;  %v135_v6 = vpop.permute.xlu0 %134  ;;  %v327_v38 = vpack.c.bf16 %v278_v26, %v278_v26  ;;  %v664_v3 = vld [vmem:[#allocation8 + $0x28] sm:$0xff] }
  0xb3   :  { %vm149_vm4 = vcmp.eq.s32.totalorder %v135_v6, %v873_v28  ;;  %v288_v18 = vadd.f32 %v287_v9, %v286_v0  ;;  %v660_v9 = vld [vmem:[#allocation8 + $0x8] sm:$0xff] }
  0xb4   :  { %vm237_vm5 = vmand %vm149_vm4, %vm213_vm3  ;;  %v282_v11 = vadd.f32 %v281_v5, %v280_v1  ;;  %v359_v47 = vunpack.c.l.b16 %v327_v38  ;;  %v666_v1 = vld [vmem:[#allocation8 + $0x38] sm:$0xff]  ;;  %vm531_vm4 = vcmp.ge.s32.totalorder %v873_v28, 7 }
  0xb5   :  { %v585_v12 = vsel %vm237_vm5, 1.0, %v824_v35  ;;  %v289_v27 = vrot.slane %v288_v18, 1  ;;  %517 = vmatpush.bf16.msra.mxu1 %v666_v1  ;;  %v662_v5 = vld [vmem:[#allocation8 + $0x18] sm:$0xff]  ;;  %vm532_vm5 = vcmp.lt.s32.totalorder %v873_v28, 9 }
  0xb6   :  { %v291_v14 = vrot.slane %v585_v12, 4  ;;  %v283_v21 = vrot.slane %v282_v11, 1  ;;  %v369_v56 = vsel %vm368_vm11, %v359_v47, %v367_v53 }
  0xb7   :  { %v290_v39 = vadd.f32 %v289_v27, %v288_v18 }
  0xb8   :  { %v292_v19 = vadd.f32 %v585_v12, %v291_v14  ;;  %v284_v31 = vadd.f32 %v283_v21, %v282_v11 }
  0xb9   :  { %v329_v48 = vpack.c.bf16 %v290_v39, %v290_v39  ;;  %518 = vmatpush.bf16.msra.mxu1 %v665_v2 }
  0xba   :  { %v293_v23 = vrot.slane %v292_v19, 2  ;;  %v206_v24 = vpop.permute.xlu0 %205  ;;  %v328_v42 = vpack.c.bf16 %v284_v31, %v284_v31 }
  0xbb   :  { %vm214_vm7 = vcmp.gt.s32.totalorder %v206_v24, 0  ;;  %v361_v54 = vunpack.c.l.b16 %v329_v48 }
  0xbc   :  { %v294_v29 = vadd.f32 %v293_v23, %v292_v19  ;;  %vm238_vm8 = vmand %vm150_vm6, %vm214_vm7  ;;  %vm530_vm7 = vcmp.lt.s32.totalorder %v873_v28, 7 }
  0xbd   :  { %v586_v32 = vsel %vm238_vm8, 1.0, %v824_v35  ;;  %v360_v35 = vunpack.c.l.b16 %v328_v42  ;;  %519 = vmatpush.bf16.msra.mxu1 %v664_v3  ;;  %vm533_vm6 = vmand %vm531_vm4, %vm532_vm5 }
  0xbe   :  { %v295_v34 = vrot.slane %v294_v29, 1  ;;  %v297_v36 = vrot.slane %v586_v32, 4  ;;  %vm906_vm8 = vmor %vm530_vm7, %vm533_vm6 }
  0xbf   :  { %v371_v58 = vsel %vm370_vm12, %v360_v35, %v369_v56 }
  0xc0   :  { %v298_v40 = vadd.f32 %v586_v32, %v297_v36  ;;  %v296_v43 = vadd.f32 %v295_v34, %v294_v29  ;;  %v373_v61 = vsel %vm372_vm13, %v361_v54, %v371_v58  ;;  %v679_v29 = vld [vmem:[%s926_s5] ss:$0 sm:$0xff]  ;;  %s565_s5 = sshll.u32 %s825_s3, 4  ;;  %s566_s5 = int_to_ptr.vmem [resolvable:$true] %s565_s5 }
  0xc1   :  { %520 = vmatpush.bf16.msra.mxu1 %v663_v4 }
  0xc2   :  { %v299_v45 = vrot.slane %v298_v40, 2  ;;  %v330_v51 = vpack.c.bf16 %v296_v43, %v296_v43 }
  0xc4   :  { %v300_v49 = vadd.f32 %v299_v45, %v298_v40  ;;  %v362_v57 = vunpack.c.l.b16 %v330_v51 }
  0xc5   :  { %521 = vmatpush.bf16.msra.mxu1 %v662_v5 }
  0xc6   :  { %v301_v52 = vrot.slane %v300_v49, 1  ;;  %v375_v62 = vsel %vm374_vm14, %v362_v57, %v373_v61 }
  0xc8   :  { %v302_v55 = vadd.f32 %v301_v52, %v300_v49 }
  0xc9   :  { %522 = vmatpush.bf16.msra.mxu1 %v661_v8 }
  0xca   :  { %v331_v59 = vpack.c.bf16 %v302_v55, %v302_v55 }
  0xcc   :  { %v363_v60 = vunpack.c.l.b16 %v331_v59 }
  0xcd   :  { %523 = vmatpush.bf16.msra.mxu1 %v660_v9 }
  0xce   :  { %v377_v63 = vsel %vm376_vm15, %v363_v60, %v375_v62 }
  0xcf   :  { %v378_v0 = vpack.c.b16 %v377_v63, %v377_v63 }
  0xd1   :  { %436 = vmatmul.bf16.vlgmr.msra.gmra.mxu0 %v378_v0  ;;  %524 = vmatpush.bf16.msra.mxu1 %v659_v10 }
  0xdc   :  { %v307_v6 = vpop.xlane.xlu1 %306 }
  0xdd   :  { %v308_v7 = vmax.f32 %v307_v6, 1.0 }
  0xdf   :  { %680 = vrcp.f32 %v308_v7  ;;  %vm314_vm0 = vweird.f32 %v308_v7  ;;  %v320_v15 = vand.u32 2147483648, %v308_v7  ;;  %v318_v17 = vand.u32 2147483647, %v308_v7 }
  0xe1   :  { %v321_v18 = vor.u32 1.1754944e-38, %v320_v15  ;;  %vm319_vm3 = vcmp.eq.f32.partialorder %v318_v17, 8.507059e+37 }
  0xe5   :  { %v681_v11 = vpop.eup %680 }
  0xe6   :  { %v310_v12 = vmul.f32 %v681_v11, %v308_v7  ;;  %vm315_vm1 = vweird.f32 %v681_v11 }
  0xe7   :  { %vm316_vm2 = vmor %vm314_vm0, %vm315_vm1 }
  0xe8   :  { %v311_v13 = vsub.f32 1.0, %v310_v12 }
  0xea   :  { %v312_v14 = vmul.f32 %v681_v11, %v311_v13 }
  0xec   :  { %v313_v16 = vadd.f32 %v681_v11, %v312_v14 }
  0xee   :  { %v317_v19 = vsel %vm316_vm2, %v681_v11, %v313_v16 }
  0xef   :  { %v322_v21 = vsel %vm319_vm3, %v321_v18, %v317_v19 }
 0x14e   :  { %v437_v22 = vpop.f32.mrf.mxu0 }
 0x14f   :  { %v441_v23 = vmul.f32 %v437_v22, %v322_v21 }
 0x151   :  { %v446_v24 = vadd.f32 %v678_v20, %v441_v23 }
 0x153   :  { %682 = vtanh.f32 %v446_v24 }
 0x156   :  { %v439_v25 = vpop.f32.mrf.mxu0 }
 0x159   :  { %v683_v26 = vpop.eup %682 }
 0x15a   :  { %v448_v27 = vpack.c.bf16 %v683_v26, %v683_v26 }
 0x15c   :  { %525 = vmatmul.bf16.vlgmr.msra.gmra.mxu1 %v448_v27 }
 0x1d9   :  { %v526_v30 = vpop.f32.mrf.mxu1 }
 0x1da   :  { %v527_v31 = vadd.f32 %v679_v29, %v526_v30 }
 0x1dc   :  { %v538_v32 = vsel %vm533_vm6, %v527_v31, -1e+30  ;;  %v535_v33 = vsel %vm530_vm7, %v527_v31, -1e+30 }
 0x1dd   :  { %539 = vmax.xlane.f32.xlu0 %v538_v32  ;;  %536 = vmax.xlane.f32.xlu2 %v535_v33 }
 0x1e1   :  { %v528_v34 = vpop.f32.mrf.mxu1 }
 0x250   :  { %v540_v36 = vpop.xlane.xlu0 %539  ;;  %v537_v37 = vpop.xlane.xlu2 %536 }
 0x251   :  { %v541_v38 = vsel %vm530_vm7, %v537_v37, %v540_v36 }
 0x252   :  { %v542_v39 = vsub.f32 %v527_v31, %v541_v38 }
 0x254   :  { %v543_v40 = vmul.f32 1.442695, %v542_v39 }
 0x256   :  { %684 = vpow2.f32 %v543_v40 }
 0x25c   :  { %v685_v42 = vpop.eup %684 }
 0x25d   :  { %v545_v43 = vsel %vm906_vm8, %v685_v42, 0.0 }
 0x25e   :  { %549 = vadd.xlane.f32.xlu1 %v545_v43  ;;  %v546_v44 = vsel %vm530_vm7, %v545_v43, 0.0 }
 0x25f   :  { %547 = vadd.xlane.f32.xlu2 %v546_v44 }
 0x2d1   :  { %v550_v45 = vpop.xlane.xlu1 %549 }
 0x2d2   :  { %v548_v46 = vpop.xlane.xlu2 %547 }
 0x2d3   :  { %v551_v47 = vsub.f32 %v550_v45, %v548_v46  ;;  %686 = vlog2.f32 %v548_v46 }
 0x2d5   :  { %688 = vlog2.f32 %v551_v47 }
 0x2d9   :  { %v687_v48 = vpop.eup %686 }
 0x2da   :  { %v553_v50 = vmul.f32 0.6931472, %v687_v48 }
 0x2db   :  { %v689_v49 = vpop.eup %688 }
 0x2dc   :  { %v555_v35 = vmul.f32 0.6931472, %v689_v49 }
 0x2de   :  { %v556_v51 = vsel %vm530_vm7, %v553_v50, %v555_v35 }
 0x2df   :  { %v557_v52 = vsub.f32 %v542_v39, %v556_v51 }
 0x2e1   :  { %v558_v53 = vsel %vm906_vm8, %v557_v52, 0.0 }
 0x2e2   :  { %559 = vst [vmem:[#allocation10] sm:$0xff] %v558_v53 }
 0x2e3   :  { %570 = dma.vmem_to_hbm [thread:$0]  %s566_s5, 128, %s568_s21, [#allocation4]  }
 0x2e4   :  { %816 = dma.done.wait [#allocation4], 128  }
 0x2e5   :  { %817 = vsyncadd [#allocation4], 4294967168 }
 0x2e6   :  { %575 = vsyncpa [#allocation3], 1 }
 0x2e7   :  { %576 = vsyncpa [#allocation6], 1 }
 0x2e8   :  { %577 = vsyncpa [#allocation9], 1 }
 0x2e9   :  { %578 = vsyncpa [#allocation4], 1 }

</bundles_post_ra>
